<compile_context>
chip_gen: v6e
topology: v6e:2x2x1
jax: 0.10.0
libtpu: 0.0.40
codegen_flags: <defaults>
</compile_context>

<pallas_src>
import jax
import jax.numpy as jnp
from jax.experimental import pallas as pl
from jax.experimental.pallas import tpu as pltpu


F_PAD = 128                               # uniform lane-padded feature width (max hidden = 128)
_RESIDENT_H_MAX_BYTES = 8 * 1024 * 1024   # keep H VMEM-resident up to 8 MiB (n_pad <= 32768)

_VMEM_LIMIT_CACHE = None


def _vmem_limit():
    """Per-chip scoped-VMEM budget: capacity minus headroom (v7x -> 48 MiB, v5e/v6e -> 96 MiB)."""
    global _VMEM_LIMIT_CACHE
    if _VMEM_LIMIT_CACHE is None:
        try:
            cap = int(pltpu.get_tpu_info().vmem_capacity_bytes)
        except Exception:
            cap = 64 << 20                  # conservative (v7x-sized) if query unavailable
        _VMEM_LIMIT_CACHE = int(min(max(cap - (16 << 20), 32 << 20), 96 << 20))
    return _VMEM_LIMIT_CACHE


# ---------------------------------------------------------------------------
# Kernels
# ---------------------------------------------------------------------------
def _layer_kernel_single_k(tm):
    """k-grid == 1: whole H resident, no accumulator scratch / init-finalize overhead."""
    def kernel(a_ref, h_ref, wrel_ref, brel_ref, wroot_ref, out_ref):
        i = pl.program_id(0)
        agg = jnp.dot(a_ref[...].astype(jnp.bfloat16), h_ref[...],
                      preferred_element_type=jnp.float32)
        rs = pl.multiple_of(i * tm, tm)
        hrow = h_ref[pl.ds(rs, tm), :].astype(jnp.float32)
        h_out = (jnp.dot(agg, wrel_ref[...], preferred_element_type=jnp.float32)
                 + brel_ref[...]
                 + jnp.dot(hrow, wroot_ref[...], preferred_element_type=jnp.float32))
        out_ref[...] = jnp.maximum(h_out, 0.0).astype(out_ref.dtype)
    return kernel


def _layer_kernel_resident(tm, tk):
    """Multi-k grid, H resident in VMEM (sliced with pl.ds), f32 accumulator scratch."""
    def kernel(a_ref, h_ref, wrel_ref, brel_ref, wroot_ref, out_ref, acc_ref):
        i = pl.program_id(0)
        k = pl.program_id(1)

        @pl.when(k == 0)
        def _():
            acc_ref[...] = jnp.zeros_like(acc_ref)

        ks = pl.multiple_of(k * tk, tk)
        acc_ref[...] += jnp.dot(a_ref[...].astype(jnp.bfloat16),
                                h_ref[pl.ds(ks, tk), :],
                                preferred_element_type=jnp.float32)

        @pl.when(k == pl.num_programs(1) - 1)
        def _():
            rs = pl.multiple_of(i * tm, tm)
            hrow = h_ref[pl.ds(rs, tm), :].astype(jnp.float32)
            h_out = (jnp.dot(acc_ref[...], wrel_ref[...],
                             preferred_element_type=jnp.float32)
                     + brel_ref[...]
                     + jnp.dot(hrow, wroot_ref[...],
                               preferred_element_type=jnp.float32))
            out_ref[...] = jnp.maximum(h_out, 0.0).astype(out_ref.dtype)
    return kernel


def _layer_kernel_streaming(a_ref, hk_ref, hrow_ref, wrel_ref, brel_ref, wroot_ref,
                            out_ref, acc_ref):
    """Multi-k grid, H streamed per tile (very large graphs where H does not fit VMEM)."""
    k = pl.program_id(1)

    @pl.when(k == 0)
    def _():
        acc_ref[...] = jnp.zeros_like(acc_ref)

    acc_ref[...] += jnp.dot(a_ref[...].astype(jnp.bfloat16), hk_ref[...],
                            preferred_element_type=jnp.float32)

    @pl.when(k == pl.num_programs(1) - 1)
    def _():
        h_out = (jnp.dot(acc_ref[...], wrel_ref[...], preferred_element_type=jnp.float32)
                 + brel_ref[...]
                 + jnp.dot(hrow_ref[...].astype(jnp.float32), wroot_ref[...],
                           preferred_element_type=jnp.float32))
        out_ref[...] = jnp.maximum(h_out, 0.0).astype(out_ref.dtype)


def _pool_linear_kernel(p_ref, h_ref, invc_ref, wl_ref, bl_ref, out_ref, acc_ref):
    """global_mean_pool (exact 0/1 one-hot @ H, rescaled by 1/count) fused with final Linear."""
    k = pl.program_id(0)

    @pl.when(k == 0)
    def _():
        acc_ref[...] = jnp.zeros_like(acc_ref)

    acc_ref[...] += jnp.dot(p_ref[...], h_ref[...], preferred_element_type=jnp.float32)

    @pl.when(k == pl.num_programs(0) - 1)
    def _():
        pooled = acc_ref[...] * invc_ref[...]
        out_ref[...] = (jnp.dot(pooled, wl_ref[...], preferred_element_type=jnp.float32)
                        + bl_ref[...])


# ---------------------------------------------------------------------------
# Wrappers
# ---------------------------------------------------------------------------
def _round_up(x, m):
    return (x + m - 1) // m * m


def _pad2(a, rows, cols):
    return jnp.pad(a, ((0, rows - a.shape[0]), (0, cols - a.shape[1])))


def _pick_tiles(n):
    """(tm, tk, n_pad): row tile, contraction tile, padded node count."""
    if n <= 128:
        return 128, 128, 128
    if n <= 512:
        n_pad = _round_up(n, 256)
        return 128, n_pad, n_pad          # k-grid == 1; >=2 row tiles for v7x megacore
    if n <= 2048:
        n_pad = _round_up(n, 512)
        return 256, 512, n_pad
    # Large graphs: 512x2048 int8 A tiles (1 MiB per buffer) keep the kernel HBM-bound
    # on the A stream while staying comfortably inside even v7x's 64 MiB VMEM.
    return 512, 2048, _round_up(n, 2048)


def _a_spec(index_map, tm, tk, extra_buffering):
    if extra_buffering:
        try:
            return pl.BlockSpec((tm, tk), index_map, pipeline_mode=pl.Buffered(3))
        except Exception:                 # older jax without pipeline_mode support
            pass
    return pl.BlockSpec((tm, tk), index_map)


def _graphconv_layer(a_i8, h, w_rel, b_rel, w_root, *, tm, tk, resident, buffered_a):
    n_pad = a_i8.shape[0]
    f = F_PAD
    single_k = (tk == n_pad)

    flops = int(2 * n_pad * n_pad * f + 4 * n_pad * f * f)
    w_bytes = int(2 * f * f * 4 + f * 4)

    if single_k:
        grid = (n_pad // tm,)
        kernel = _layer_kernel_single_k(tm)
        in_specs = [
            _a_spec(lambda i: (i, 0), tm, tk, buffered_a),    # A row stripe (int8)
            pl.BlockSpec((n_pad, f), lambda i: (0, 0)),       # H resident (bf16)
            pl.BlockSpec((f, f), lambda i: (0, 0)),           # W_rel (resident)
            pl.BlockSpec((1, f), lambda i: (0, 0)),           # b_rel (resident)
            pl.BlockSpec((f, f), lambda i: (0, 0)),           # W_root (resident)
        ]
        out_specs = pl.BlockSpec((tm, f), lambda i: (i, 0))
        scratch = []
        operands = (a_i8, h, w_rel, b_rel, w_root)
        semantics = ("parallel",)
        h_bytes = n_pad * f * 2
    elif resident:
        grid = (n_pad // tm, n_pad // tk)
        kernel = _layer_kernel_resident(tm, tk)
        in_specs = [
            _a_spec(lambda i, k: (i, k), tm, tk, buffered_a),  # A tile (int8, streamed)
            pl.BlockSpec((n_pad, f), lambda i, k: (0, 0)),     # H resident across grid
            pl.BlockSpec((f, f), lambda i, k: (0, 0)),         # W_rel (resident)
            pl.BlockSpec((1, f), lambda i, k: (0, 0)),         # b_rel (resident)
            pl.BlockSpec((f, f), lambda i, k: (0, 0)),         # W_root (resident)
        ]
        out_specs = pl.BlockSpec((tm, f), lambda i, k: (i, 0))
        scratch = [pltpu.VMEM((tm, f), jnp.float32)]
        operands = (a_i8, h, w_rel, b_rel, w_root)
        semantics = ("parallel", "arbitrary")
        h_bytes = n_pad * f * 2
    else:
        grid = (n_pad // tm, n_pad // tk)
        kernel = _layer_kernel_streaming
        in_specs = [
            _a_spec(lambda i, k: (i, k), tm, tk, buffered_a),  # A tile (int8, streamed)
            pl.BlockSpec((tk, f), lambda i, k: (k, 0)),        # H contraction tile (bf16)
            pl.BlockSpec((tm, f), lambda i, k: (i, 0)),        # H row tile (root term)
            pl.BlockSpec((f, f), lambda i, k: (0, 0)),         # W_rel (resident)
            pl.BlockSpec((1, f), lambda i, k: (0, 0)),         # b_rel (resident)
            pl.BlockSpec((f, f), lambda i, k: (0, 0)),         # W_root (resident)
        ]
        out_specs = pl.BlockSpec((tm, f), lambda i, k: (i, 0))
        scratch = [pltpu.VMEM((tm, f), jnp.float32)]
        operands = (a_i8, h, h, w_rel, b_rel, w_root)
        semantics = ("parallel", "arbitrary")
        # hk is re-fetched once per row tile: (n_pad/tm) full passes over H.
        h_bytes = (n_pad // tm) * n_pad * f * 2 + n_pad * f * 2

    bytes_accessed = int(n_pad * n_pad * 1 + h_bytes + n_pad * f * 2 + w_bytes)

    return pl.pallas_call(
        kernel,
        out_shape=jax.ShapeDtypeStruct((n_pad, f), jnp.bfloat16),
        grid_spec=pltpu.PrefetchScalarGridSpec(
            num_scalar_prefetch=0,
            grid=grid,
            in_specs=in_specs,
            out_specs=out_specs,
            scratch_shapes=scratch,
        ),
        compiler_params=pltpu.CompilerParams(
            dimension_semantics=semantics,
            vmem_limit_bytes=_vmem_limit(),
        ),
        cost_estimate=pl.CostEstimate(flops=flops, transcendentals=0,
                                      bytes_accessed=bytes_accessed),
    )(*operands)


def _pool_linear(onehot, inv_counts, h, w_lin, b_lin, *, tk):
    n_pad, f = h.shape
    g_pad = onehot.shape[0]
    grid = (n_pad // tk,)
    return pl.pallas_call(
        _pool_linear_kernel,
        out_shape=jax.ShapeDtypeStruct((g_pad, f), jnp.float32),
        grid_spec=pltpu.PrefetchScalarGridSpec(
            num_scalar_prefetch=0,
            grid=grid,
            in_specs=[
                pl.BlockSpec((g_pad, tk), lambda k: (0, k)),   # one-hot tile (bf16, exact 0/1)
                pl.BlockSpec((tk, f), lambda k: (k, 0)),       # H4 contraction tile (bf16)
                pl.BlockSpec((g_pad, 1), lambda k: (0, 0)),    # 1/count (f32, resident)
                pl.BlockSpec((f, f), lambda k: (0, 0)),        # W_lin (resident)
                pl.BlockSpec((1, f), lambda k: (0, 0)),        # b_lin (resident)
            ],
            out_specs=pl.BlockSpec((g_pad, f), lambda k: (0, 0)),
            scratch_shapes=[pltpu.VMEM((g_pad, f), jnp.float32)],
        ),
        compiler_params=pltpu.CompilerParams(
            dimension_semantics=("arbitrary",),
            vmem_limit_bytes=_vmem_limit(),
        ),
    )(onehot, h, inv_counts, w_lin, b_lin)


def gnns_forward(x, edge_index, batch, params, num_graphs, force_streaming=False):
    """x: [N, F] f32, edge_index: [2, E] int32 (src, dst), batch: [N] int32."""
    *convs, (wl, bl) = params
    n = x.shape[0]
    num_classes = wl.shape[1]
    tm, tk, n_pad = _pick_tiles(n)
    g_pad = _round_up(max(num_graphs, 1), 16)
    resident = (not force_streaming) and (n_pad * F_PAD * 2 <= _RESIDENT_H_MAX_BYTES)
    buffered_a = n_pad > 2048            # deepen the A pipeline on the large-graph branch

    # --- plain-JAX glue: dense summed-message adjacency built DIRECTLY in int8.
    #     agg[i] = sum_{e: dst[e]==i} H[src[e]]  =>  A[dst, src] += 1 per edge.
    #     Exact for edge multiplicity <= 127 (typical graphs have multiplicity 1).
    src, dst = edge_index[0], edge_index[1]
    a = jnp.zeros((n_pad, n_pad), jnp.int8).at[dst, src].add(1)

    # --- mean-pool operands: exact 0/1 one-hot in bf16 + f32 inverse counts.
    #     Padded nodes get an out-of-range graph id -> all-zero pool columns.
    batch_pad = jnp.full((n_pad,), g_pad, jnp.int32).at[:n].set(batch)
    onehot = (batch_pad[None, :] == jnp.arange(g_pad)[:, None])
    inv_counts = 1.0 / jnp.maximum(onehot.sum(axis=1, keepdims=True).astype(jnp.float32), 1.0)
    onehot = onehot.astype(jnp.bfloat16)

    # --- node features: lane-pad to 128 and carry in bf16 end-to-end.
    #     Zero feature-padding stays zero through every layer; padded node rows only
    #     ever pick up b_rel and never contaminate real rows (their A / pool columns
    #     are identically zero).
    h = _pad2(x, n_pad, F_PAD).astype(jnp.bfloat16)
    for (w_rel, b_rel, w_root) in convs:
        h = _graphconv_layer(a, h,
                             _pad2(w_rel, F_PAD, F_PAD),
                             _pad2(b_rel, 1, F_PAD),
                             _pad2(w_root, F_PAD, F_PAD),
                             tm=tm, tk=tk, resident=resident, buffered_a=buffered_a)

    out = _pool_linear(onehot, inv_counts, h,
                       _pad2(wl, F_PAD, F_PAD), _pad2(bl, 1, F_PAD), tk=tk)
    return out[:num_graphs, :num_classes].reshape(-1)     # matches torch .reshape(-1)


# ---------------------------------------------------------------------------
# Parameters & pure-JAX reference
# ---------------------------------------------------------------------------
def init_params(key, num_features, num_classes):
    def glorot(k, shape):
        lim = jnp.sqrt(6.0 / (shape[0] + shape[1]))
        return jax.random.uniform(k, shape, jnp.float32, -lim, lim)

    dims = [(num_features, 16), (16, 32), (32, 64), (64, 128)]
    ks = jax.random.split(key, 2 * len(dims) + 1)
    convs = []
    for i, (fi, fo) in enumerate(dims):
        w_rel = glorot(ks[2 * i], (fi, fo))
        b_rel = jnp.zeros((1, fo), jnp.float32)      # lin_rel has bias; lin_root does not
        w_root = glorot(ks[2 * i + 1], (fi, fo))
        convs.append((w_rel, b_rel, w_root))
    wl = glorot(ks[-1], (128, num_classes))
    bl = jnp.zeros((1, num_classes), jnp.float32)
    return tuple(convs) + ((wl, bl),)


def gnns_reference(x, edge_index, batch, params, num_graphs):
    *convs, (wl, bl) = params
    n = x.shape[0]
    src, dst = edge_index[0], edge_index[1]
    a = jnp.zeros((n, n), jnp.float32).at[dst, src].add(1.0)
    h = x
    for w_rel, b_rel, w_root in convs:
        h = jnp.maximum(a @ h @ w_rel + b_rel + h @ w_root, 0.0)
    onehot = (batch[None, :] == jnp.arange(num_graphs)[:, None]).astype(jnp.float32)
    pooled = (onehot @ h) / jnp.maximum(onehot.sum(axis=1, keepdims=True), 1.0)
    return (pooled @ wl + bl).reshape(-1)


# ---------------------------------------------------------------------------
if __name__ == "__main__":
    key = jax.random.PRNGKey(0)
    num_features, num_classes = 4, 3
    k_x, k_p, k_x2, k_s2, k_d2, k_b2 = jax.random.split(key, 6)

    # --- test 1: small deterministic example (two 4-node ring graphs) ----------
    n_nodes, num_graphs = 8, 2
    x = jax.random.normal(k_x, (n_nodes, num_features), jnp.float32)

    def ring(offset):
        s = jnp.array([0, 1, 2, 3], jnp.int32) + offset
        d = jnp.array([1, 2, 3, 0], jnp.int32) + offset
        return jnp.concatenate([s, d]), jnp.concatenate([d, s])

    s0, d0 = ring(0)
    s1, d1 = ring(4)
    edge_index = jnp.stack([jnp.concatenate([s0, s1]),
                            jnp.concatenate([d0, d1])])              # [2, 16]
    batch = jnp.array([0, 0, 0, 0, 1, 1, 1, 1], jnp.int32)

    # NOTE: the original forward's unused `indx` tensor is dead code and omitted.
    params = init_params(k_p, num_features, num_classes)

    fwd = jax.jit(gnns_forward, static_argnums=(4, 5))
    out = fwd(x, edge_index, batch, params, num_graphs, False)
    jax.block_until_ready(out)
    ref = gnns_reference(x, edge_index, batch, params, num_graphs)
    assert out.shape == (num_graphs * num_classes,)
    assert jnp.allclose(out, ref, atol=5e-2, rtol=5e-2), (out, ref)  # bf16 tolerance

    # --- test 2: medium random graph — exercises the multi-k resident kernel and
    #     (via force_streaming) the streaming fallback used for very large graphs.
    n2, g2, e2 = 600, 3, 1800
    x2 = jax.random.normal(k_x2, (n2, num_features), jnp.float32)
    edge_index2 = jnp.stack([jax.random.randint(k_s2, (e2,), 0, n2, jnp.int32),
                             jax.random.randint(k_d2, (e2,), 0, n2, jnp.int32)])
    batch2 = jnp.sort(jax.random.randint(k_b2, (n2,), 0, g2, jnp.int32))
    ref2 = gnns_reference(x2, edge_index2, batch2, params, g2)
    for streaming in (False, True):
        out2 = jax.block_until_ready(fwd(x2, edge_index2, batch2, params, g2, streaming))
        assert out2.shape == (g2 * num_classes,)
        assert jnp.allclose(out2, ref2, atol=1e-1, rtol=1e-1), (streaming, out2, ref2)

    print("KERNEL_OK")
</pallas_src>

<mosaic_0001>
module attributes {stable_mosaic.version = 11 : i64} {
  func.func @kernel(%arg0: i32, %arg1: memref<128x128xi8, #tpu.memory_space<vmem>>, %arg2: memref<128x128xbf16, #tpu.memory_space<vmem>>, %arg3: memref<128x128xf32, #tpu.memory_space<vmem>>, %arg4: memref<1x128xf32, #tpu.memory_space<vmem>>, %arg5: memref<128x128xf32, #tpu.memory_space<vmem>>, %arg6: memref<128x128xbf16, #tpu.memory_space<vmem>>) attributes {dimension_semantics = [#tpu.dimension_semantics<parallel>], iteration_bounds = array<i64: 1>, scalar_prefetch = 0 : i64, scratch_operands = 0 : i64, tpu.core_type = #tpu.core_type<tc>, window_params = [{transform_indices = @transform_0, window_bounds = array<i64: 128, 128>}, {pipeline_mode = #tpu.pipeline_mode<synchronous>, transform_indices = @transform_1, window_bounds = array<i64: 128, 128>}, {pipeline_mode = #tpu.pipeline_mode<synchronous>, transform_indices = @transform_2, window_bounds = array<i64: 128, 128>}, {pipeline_mode = #tpu.pipeline_mode<synchronous>, transform_indices = @transform_3, window_bounds = array<i64: 1, 128>}, {pipeline_mode = #tpu.pipeline_mode<synchronous>, transform_indices = @transform_4, window_bounds = array<i64: 128, 128>}, {transform_indices = @transform_5, window_bounds = array<i64: 128, 128>}]} {
    %c0 = arith.constant 0 : index
    %c0_0 = arith.constant 0 : index
    %0 = vector.load %arg1[%c0, %c0_0] : memref<128x128xi8, #tpu.memory_space<vmem>>, vector<128x128xi8>
    %1 = arith.sitofp %0 : vector<128x128xi8> to vector<128x128xbf16>
    %c0_1 = arith.constant 0 : index
    %c0_2 = arith.constant 0 : index
    %2 = vector.load %arg2[%c0_1, %c0_2] : memref<128x128xbf16, #tpu.memory_space<vmem>>, vector<128x128xbf16>
    %cst = arith.constant dense<0.000000e+00> : vector<128x128xf32>
    %3 = tpu.matmul %1, %2, %cst {dimension_numbers = #tpu.dot_dimension_numbers<[1], [0], [0], [1], [0, 0, 1, 1], [], []>} : vector<128x128xbf16>, vector<128x128xbf16>, vector<128x128xf32> -> vector<128x128xf32>
    %c128_i32 = arith.constant 128 : i32
    %4 = arith.muli %arg0, %c128_i32 : i32
    %5 = tpu.assume_multiple %4, 128 : i32
    %6 = arith.index_cast %5 : i32 to index
    %c0_3 = arith.constant 0 : index
    %7 = vector.load %arg2[%6, %c0_3] : memref<128x128xbf16, #tpu.memory_space<vmem>>, vector<128x128xbf16>
    %8 = arith.extf %7 : vector<128x128xbf16> to vector<128x128xf32>
    %c0_4 = arith.constant 0 : index
    %c0_5 = arith.constant 0 : index
    %9 = vector.load %arg3[%c0_4, %c0_5] : memref<128x128xf32, #tpu.memory_space<vmem>>, vector<128x128xf32>
    %cst_6 = arith.constant dense<0.000000e+00> : vector<128x128xf32>
    %10 = tpu.matmul %3, %9, %cst_6 {dimension_numbers = #tpu.dot_dimension_numbers<[1], [0], [0], [1], [0, 0, 1, 1], [], []>} : vector<128x128xf32>, vector<128x128xf32>, vector<128x128xf32> -> vector<128x128xf32>
    %c0_7 = arith.constant 0 : index
    %c0_8 = arith.constant 0 : index
    %11 = vector.load %arg4[%c0_7, %c0_8] : memref<1x128xf32, #tpu.memory_space<vmem>>, vector<1x128xf32>
    %12 = vector.broadcast %11 : vector<1x128xf32> to vector<128x128xf32>
    %13 = arith.addf %10, %12 : vector<128x128xf32>
    %c0_9 = arith.constant 0 : index
    %c0_10 = arith.constant 0 : index
    %14 = vector.load %arg5[%c0_9, %c0_10] : memref<128x128xf32, #tpu.memory_space<vmem>>, vector<128x128xf32>
    %cst_11 = arith.constant dense<0.000000e+00> : vector<128x128xf32>
    %15 = tpu.matmul %8, %14, %cst_11 {dimension_numbers = #tpu.dot_dimension_numbers<[1], [0], [0], [1], [0, 0, 1, 1], [], []>} : vector<128x128xf32>, vector<128x128xf32>, vector<128x128xf32> -> vector<128x128xf32>
    %16 = arith.addf %13, %15 : vector<128x128xf32>
    %cst_12 = arith.constant 0.000000e+00 : f32
    %17 = vector.broadcast %cst_12 : f32 to vector<128x128xf32>
    %18 = arith.maximumf %16, %17 : vector<128x128xf32>
    %19 = arith.truncf %18 : vector<128x128xf32> to vector<128x128xbf16>
    %c0_13 = arith.constant 0 : index
    %c0_14 = arith.constant 0 : index
    %20 = vector.load %arg6[%c0_13, %c0_14] : memref<128x128xbf16, #tpu.memory_space<vmem>>, vector<128x128xbf16>
    tpu.vector_store %arg6[%c0_13, %c0_14], %19 {strides = array<i32>} : memref<128x128xbf16, #tpu.memory_space<vmem>>, vector<128x128xbf16>,
    return
  }
  func.func @transform_0(%arg0: i32) -> (i32, i32) {
    %c0_i32 = arith.constant 0 : i32
    %c0_i32_0 = arith.constant 0 : i32
    return %arg0, %c0_i32 : i32, i32
  }
  func.func @transform_1(%arg0: i32) -> (i32, i32) {
    %c0_i32 = arith.constant 0 : i32
    %c0_i32_0 = arith.constant 0 : i32
    %c0_i32_1 = arith.constant 0 : i32
    return %c0_i32, %c0_i32_0 : i32, i32
  }
  func.func @transform_2(%arg0: i32) -> (i32, i32) {
    %c0_i32 = arith.constant 0 : i32
    %c0_i32_0 = arith.constant 0 : i32
    %c0_i32_1 = arith.constant 0 : i32
    return %c0_i32, %c0_i32_0 : i32, i32
  }
  func.func @transform_3(%arg0: i32) -> (i32, i32) {
    %c0_i32 = arith.constant 0 : i32
    %c0_i32_0 = arith.constant 0 : i32
    %c0_i32_1 = arith.constant 0 : i32
    return %c0_i32, %c0_i32_0 : i32, i32
  }
  func.func @transform_4(%arg0: i32) -> (i32, i32) {
    %c0_i32 = arith.constant 0 : i32
    %c0_i32_0 = arith.constant 0 : i32
    %c0_i32_1 = arith.constant 0 : i32
    return %c0_i32, %c0_i32_0 : i32, i32
  }
  func.func @transform_5(%arg0: i32) -> (i32, i32) {
    %c0_i32 = arith.constant 0 : i32
    %c0_i32_0 = arith.constant 0 : i32
    return %arg0, %c0_i32 : i32, i32
  }
}

module attributes {stable_mosaic.version = 11 : i64} {
  func.func @_pool_linear_kernel(%arg0: i32, %arg1: memref<16x128xbf16, #tpu.memory_space<vmem>>, %arg2: memref<128x128xbf16, #tpu.memory_space<vmem>>, %arg3: memref<16x1xf32, #tpu.memory_space<vmem>>, %arg4: memref<128x128xf32, #tpu.memory_space<vmem>>, %arg5: memref<1x128xf32, #tpu.memory_space<vmem>>, %arg6: memref<16x128xf32, #tpu.memory_space<vmem>>, %arg7: memref<16x128xf32, #tpu.memory_space<vmem>>) attributes {dimension_semantics = [#tpu.dimension_semantics<arbitrary>], iteration_bounds = array<i64: 1>, scalar_prefetch = 0 : i64, scratch_operands = 1 : i64, tpu.core_type = #tpu.core_type<tc>, window_params = [{transform_indices = @transform_0, window_bounds = array<i64: 16, 128>}, {transform_indices = @transform_1, window_bounds = array<i64: 128, 128>}, {pipeline_mode = #tpu.pipeline_mode<synchronous>, transform_indices = @transform_2, window_bounds = array<i64: 16, 1>}, {pipeline_mode = #tpu.pipeline_mode<synchronous>, transform_indices = @transform_3, window_bounds = array<i64: 128, 128>}, {pipeline_mode = #tpu.pipeline_mode<synchronous>, transform_indices = @transform_4, window_bounds = array<i64: 1, 128>}, {pipeline_mode = #tpu.pipeline_mode<synchronous>, transform_indices = @transform_5, window_bounds = array<i64: 16, 128>}]} {
    %c0_i32 = arith.constant 0 : i32
    %0 = arith.cmpi eq, %arg0, %c0_i32 : i32
    %1 = arith.extui %0 : i1 to i32
    %c0_i32_0 = arith.constant 0 : i32
    %2 = arith.cmpi ne, %1, %c0_i32_0 : i32
    scf.if %2 {
      %cst_10 = arith.constant 0.000000e+00 : f32
      %12 = vector.broadcast %cst_10 : f32 to vector<16x128xf32>
      %c0_11 = arith.constant 0 : index
      %c0_12 = arith.constant 0 : index
      %13 = vector.load %arg7[%c0_11, %c0_12] : memref<16x128xf32, #tpu.memory_space<vmem>>, vector<16x128xf32>
      tpu.vector_store %arg7[%c0_11, %c0_12], %12 {strides = array<i32>} : memref<16x128xf32, #tpu.memory_space<vmem>>, vector<16x128xf32>,
    } else {
    }
    %c0 = arith.constant 0 : index
    %c0_1 = arith.constant 0 : index
    %3 = vector.load %arg7[%c0, %c0_1] : memref<16x128xf32, #tpu.memory_space<vmem>>, vector<16x128xf32>
    %c0_2 = arith.constant 0 : index
    %c0_3 = arith.constant 0 : index
    %4 = vector.load %arg1[%c0_2, %c0_3] : memref<16x128xbf16, #tpu.memory_space<vmem>>, vector<16x128xbf16>
    %c0_4 = arith.constant 0 : index
    %c0_5 = arith.constant 0 : index
    %5 = vector.load %arg2[%c0_4, %c0_5] : memref<128x128xbf16, #tpu.memory_space<vmem>>, vector<128x128xbf16>
    %cst = arith.constant dense<0.000000e+00> : vector<16x128xf32>
    %6 = tpu.matmul %4, %5, %cst {dimension_numbers = #tpu.dot_dimension_numbers<[1], [0], [0], [1], [0, 0, 1, 1], [], []>} : vector<16x128xbf16>, vector<128x128xbf16>, vector<16x128xf32> -> vector<16x128xf32>
    %7 = arith.addf %3, %6 : vector<16x128xf32>
    %c0_6 = arith.constant 0 : index
    %c0_7 = arith.constant 0 : index
    %8 = vector.load %arg7[%c0_6, %c0_7] : memref<16x128xf32, #tpu.memory_space<vmem>>, vector<16x128xf32>
    tpu.vector_store %arg7[%c0_6, %c0_7], %7 {strides = array<i32>} : memref<16x128xf32, #tpu.memory_space<vmem>>, vector<16x128xf32>,
    %c0_i32_8 = arith.constant 0 : i32
    %9 = arith.cmpi eq, %arg0, %c0_i32_8 : i32
    %10 = arith.extui %9 : i1 to i32
    %c0_i32_9 = arith.constant 0 : i32
    %11 = arith.cmpi ne, %10, %c0_i32_9 : i32
    scf.if %11 {
      %c0_10 = arith.constant 0 : index
      %c0_11 = arith.constant 0 : index
      %12 = vector.load %arg7[%c0_10, %c0_11] : memref<16x128xf32, #tpu.memory_space<vmem>>, vector<16x128xf32>
      %c0_12 = arith.constant 0 : index
      %c0_13 = arith.constant 0 : index
      %13 = vector.load %arg3[%c0_12, %c0_13] : memref<16x1xf32, #tpu.memory_space<vmem>>, vector<16x1xf32>
      %14 = vector.broadcast %13 : vector<16x1xf32> to vector<16x128xf32>
      %15 = arith.mulf %12, %14 : vector<16x128xf32>
      %c0_14 = arith.constant 0 : index
      %c0_15 = arith.constant 0 : index
      %16 = vector.load %arg4[%c0_14, %c0_15] : memref<128x128xf32, #tpu.memory_space<vmem>>, vector<128x128xf32>
      %cst_16 = arith.constant dense<0.000000e+00> : vector<16x128xf32>
      %17 = tpu.matmul %15, %16, %cst_16 {dimension_numbers = #tpu.dot_dimension_numbers<[1], [0], [0], [1], [0, 0, 1, 1], [], []>} : vector<16x128xf32>, vector<128x128xf32>, vector<16x128xf32> -> vector<16x128xf32>
      %c0_17 = arith.constant 0 : index
      %c0_18 = arith.constant 0 : index
      %18 = vector.load %arg5[%c0_17, %c0_18] : memref<1x128xf32, #tpu.memory_space<vmem>>, vector<1x128xf32>
      %19 = vector.broadcast %18 : vector<1x128xf32> to vector<16x128xf32>
      %20 = arith.addf %17, %19 : vector<16x128xf32>
      %c0_19 = arith.constant 0 : index
      %c0_20 = arith.constant 0 : index
      %21 = vector.load %arg6[%c0_19, %c0_20] : memref<16x128xf32, #tpu.memory_space<vmem>>, vector<16x128xf32>
      tpu.vector_store %arg6[%c0_19, %c0_20], %20 {strides = array<i32>} : memref<16x128xf32, #tpu.memory_space<vmem>>, vector<16x128xf32>,
    } else {
    }
    return
  }
  func.func @transform_0(%arg0: i32) -> (i32, i32) {
    %c0_i32 = arith.constant 0 : i32
    %c0_i32_0 = arith.constant 0 : i32
    return %c0_i32, %arg0 : i32, i32
  }
  func.func @transform_1(%arg0: i32) -> (i32, i32) {
    %c0_i32 = arith.constant 0 : i32
    %c0_i32_0 = arith.constant 0 : i32
    return %arg0, %c0_i32 : i32, i32
  }
  func.func @transform_2(%arg0: i32) -> (i32, i32) {
    %c0_i32 = arith.constant 0 : i32
    %c0_i32_0 = arith.constant 0 : i32
    %c0_i32_1 = arith.constant 0 : i32
    return %c0_i32, %c0_i32_0 : i32, i32
  }
  func.func @transform_3(%arg0: i32) -> (i32, i32) {
    %c0_i32 = arith.constant 0 : i32
    %c0_i32_0 = arith.constant 0 : i32
    %c0_i32_1 = arith.constant 0 : i32
    return %c0_i32, %c0_i32_0 : i32, i32
  }
  func.func @transform_4(%arg0: i32) -> (i32, i32) {
    %c0_i32 = arith.constant 0 : i32
    %c0_i32_0 = arith.constant 0 : i32
    %c0_i32_1 = arith.constant 0 : i32
    return %c0_i32, %c0_i32_0 : i32, i32
  }
  func.func @transform_5(%arg0: i32) -> (i32, i32) {
    %c0_i32 = arith.constant 0 : i32
    %c0_i32_0 = arith.constant 0 : i32
    %c0_i32_1 = arith.constant 0 : i32
    return %c0_i32, %c0_i32_0 : i32, i32
  }
}

</mosaic_0001>

<bundles_post_ra>
// kernel: gnns_forward.9
= control target key start
LH: loop header
LB: loop body
LE: loop exit
PB: predicated region body
PF: predicated region fallthrough
CT: control target
= control target key end

     0   :  { %v374_v0 = vmov 0.0   ;;  %vm375_vm0 = vmmov 0   ;;  %v376_v2 = vmov 0   ;;  %s497_s1 = inlined_call_operand.vmem [shape: bf16[128,128], index: 1, kind: input, shape index: {}]   ;;  %s498_s2 = inlined_call_operand.vmem [shape: f32[16,1], index: 2, kind: input, shape index: {}]   ;;  %s499_s3 = inlined_call_operand.vmem [shape: f32[128,128], index: 3, kind: input, shape index: {}]   ;;  %s500_s0 = inlined_call_operand.vmem [shape: bf16[16,128], index: 0, kind: input, shape index: {}]   ;;  %s501_s4 = inlined_call_operand.vmem [shape: f32[1,128], index: 4, kind: input, shape index: {}]   ;;  %s502_s5 = inlined_call_operand.vmem [shape: f32[16,128], index: 5, kind: output, shape index: {}]  }
   0x1   :  { %306 = vmatprep.subr.bf16.mxu0 %v374_v0  ;;  %v365_v1 = vld [vmem:[%s497_s1 + $0x38] sm:$0xff]   ;;  %322 = vmatprep.mubr.msk.bf16.mxu0 %vm375_vm0, %v374_v0  ;;  %v366_v3 = vld [vmem:[%s497_s1 + $0x30] sm:$0xff]   ;;  %v367_v4 = vld [vmem:[%s497_s1 + $0x28] sm:$0xff]  }
   0x2   :  { %364 = vset.pattern.permute.xlu0 %v376_v2  ;;  %307 = vmatpush3.bf16.msra.mxu0 %v365_v1  ;;  %v151_v5 = vld [vmem:[%s498_s2] sm:$0xff]  ;;  %v180_v6 = vld [vmem:[%s499_s3 + $0x78] sm:$0xff]  ;;  %v179_v8 = vld [vmem:[%s499_s3 + $0x70] sm:$0xff] }
   0x3   :  { %308 = vmatprep.subr.bf16.mxu0 %v374_v0  ;;  %v368_v7 = vld [vmem:[%s497_s1 + $0x20] sm:$0xff]   ;;  %155 = vperm.xlu0 %364, %v151_v5   ;;  %v152_v9 = vld [vmem:[%s498_s2 + $0x8] sm:$0xff]  ;;  %v369_v11 = vld [vmem:[%s497_s1 + $0x18] sm:$0xff]  }
   0x4   :  { %326 = vmatprep.subr.mxu1 %v180_v6  ;;  %v178_v10 = vld [vmem:[%s499_s3 + $0x68] sm:$0xff]  ;;  %v177_v12 = vld [vmem:[%s499_s3 + $0x60] sm:$0xff]  ;;  %v176_v13 = vld [vmem:[%s499_s3 + $0x58] sm:$0xff] }
   0x5   :  { %327 = vmatpush3.msra.mxu1 %v180_v6  ;;  %v370_v14 = vld [vmem:[%s497_s1 + $0x10] sm:$0xff]   ;;  %v174_v16 = vld [vmem:[%s499_s3 + $0x48] sm:$0xff]  ;;  %v173_v18 = vld [vmem:[%s499_s3 + $0x40] sm:$0xff] }
   0x6   :  { %309 = vmatpush3.bf16.msra.mxu0 %v366_v3  ;;  %328 = vmatprep.subr.mxu1 %v179_v8  ;;  %v175_v15 = vld [vmem:[%s499_s3 + $0x50] sm:$0xff]  ;;  %v371_v17 = vld [vmem:[%s497_s1 + $0x8] sm:$0xff]   ;;  %v172_v19 = vld [vmem:[%s499_s3 + $0x38] sm:$0xff] }
   0x7   :  { %310 = vmatprep.subr.bf16.mxu0 %v374_v0  ;;  %160 = vperm.xlu0 %364, %v152_v9   ;;  %v372_v20 = vld [vmem:[%s497_s1] sm:$0xff]   ;;  %v171_v21 = vld [vmem:[%s499_s3 + $0x30] sm:$0xff]  ;;  %v170_v23 = vld [vmem:[%s499_s3 + $0x28] sm:$0xff] }
   0x8   :  { %329 = vmatpush3.msra.mxu1 %v179_v8  ;;  %v373_v22 = vld [vmem:[%s500_s0] sm:$0xff]   ;;  %v168_v25 = vld [vmem:[%s499_s3 + $0x18] sm:$0xff]  ;;  %v167_v26 = vld [vmem:[%s499_s3 + $0x10] sm:$0xff] }
   0x9   :  { %330 = vmatprep.subr.mxu1 %v178_v10  ;;  %v169_v24 = vld [vmem:[%s499_s3 + $0x20] sm:$0xff]  ;;  %v166_v27 = vld [vmem:[%s499_s3 + $0x8] sm:$0xff] }
   0xa   :  { %311 = vmatpush3.bf16.msra.mxu0 %v367_v4  ;;  %331 = vmatpush3.msra.mxu1 %v178_v10  ;;  %v165_v28 = vld [vmem:[%s499_s3] sm:$0xff] }
   0xb   :  { %312 = vmatprep.subr.bf16.mxu0 %v374_v0  ;;  %332 = vmatprep.subr.mxu1 %v177_v12  ;;  %v278_v37 = vld [vmem:[%s501_s4] ss:$0 sm:$0xff] }
   0xc   :  { %333 = vmatpush3.msra.mxu1 %v177_v12 }
   0xd   :  { %334 = vmatprep.subr.mxu1 %v176_v13 }
   0xe   :  { %313 = vmatpush3.bf16.msra.mxu0 %v368_v7  ;;  %335 = vmatpush3.msra.mxu1 %v176_v13 }
   0xf   :  { %314 = vmatprep.subr.bf16.mxu0 %v374_v0  ;;  %336 = vmatprep.subr.mxu1 %v175_v15 }
  0x10   :  { %337 = vmatpush3.msra.mxu1 %v175_v15 }
  0x11   :  { %338 = vmatprep.subr.mxu1 %v174_v16 }
  0x12   :  { %315 = vmatpush3.bf16.msra.mxu0 %v369_v11  ;;  %339 = vmatpush3.msra.mxu1 %v174_v16 }
  0x13   :  { %316 = vmatprep.subr.bf16.mxu0 %v374_v0  ;;  %340 = vmatprep.subr.mxu1 %v173_v18 }
  0x14   :  { %341 = vmatpush3.msra.mxu1 %v173_v18 }
  0x15   :  { %342 = vmatprep.subr.mxu1 %v172_v19 }
  0x16   :  { %317 = vmatpush3.bf16.msra.mxu0 %v370_v14  ;;  %343 = vmatpush3.msra.mxu1 %v172_v19 }
  0x17   :  { %318 = vmatprep.subr.bf16.mxu0 %v374_v0  ;;  %344 = vmatprep.subr.mxu1 %v171_v21 }
  0x18   :  { %345 = vmatpush3.msra.mxu1 %v171_v21 }
  0x19   :  { %346 = vmatprep.subr.mxu1 %v170_v23 }
  0x1a   :  { %319 = vmatpush3.bf16.msra.mxu0 %v371_v17  ;;  %347 = vmatpush3.msra.mxu1 %v170_v23 }
  0x1b   :  { %320 = vmatprep.subr.bf16.mxu0 %v374_v0  ;;  %348 = vmatprep.subr.mxu1 %v169_v24 }
  0x1c   :  { %349 = vmatpush3.msra.mxu1 %v169_v24 }
  0x1d   :  { %350 = vmatprep.subr.mxu1 %v168_v25 }
  0x1e   :  { %321 = vmatpush3.bf16.msra.mxu0 %v372_v20  ;;  %351 = vmatpush3.msra.mxu1 %v168_v25 }
  0x1f   :  { %352 = vmatprep.subr.mxu1 %v167_v26 }
  0x20   :  { %353 = vmatpush3.msra.mxu1 %v167_v26 }
  0x21   :  { %323 = vmatmul.mubr.bf16.vlgmr.msra.gmra.mxu0 %v373_v22  ;;  %354 = vmatprep.subr.mxu1 %v166_v27 }
  0x22   :  { %355 = vmatpush3.msra.mxu1 %v166_v27 }
  0x23   :  { %356 = vmatprep.subr.mxu1 %v165_v28 }
  0x24   :  { %357 = vmatpush3.msra.mxu1 %v165_v28 }
  0x7e   :  { %v156_v29 = vpop.permute.xlu0 %155 }
  0x82   :  { %v161_v33 = vpop.permute.xlu0 %160 }
  0xe1   :  { %v135_v30 = vpop.f32.mrf.mxu0 }
  0xe2   :  { %v163_v31 = vmul.f32 %v156_v29, %v135_v30 }
  0xe3   :  { %v324_v32 = vpop.f32.mrf.mxu0 }
  0xe4   :  { %358 = vmatprep.mubr.f32.mxu1 %v163_v31 }
  0xe5   :  { %v138_v34 = vpop.f32.mrf.mxu0 }
  0xe6   :  { %v164_v35 = vmul.f32 %v161_v33, %v138_v34 }
  0xe7   :  { %v325_v36 = vpop.f32.mrf.mxu0 }
  0xe8   :  { %359 = vmatmul.mubr.f32.vlgmr.msra.gmra.mxu1 %v164_v35 }
 0x1a8   :  { %v360_v38 = vpop.f32.mrf.mxu1 }
 0x1a9   :  { %v260_v39 = vadd.f32 %v360_v38, %v278_v37 }
 0x1aa   :  { %v254_v40 = vpop.f32.mrf.mxu1 }
 0x1ab   :  { %264 = vst [vmem:[%s502_s5 + $0x8] sm:$0xff] %v260_v39  ;;  %v255_v41 = vadd.f32 %v278_v37, %v254_v40 }
 0x1ad   :  { %263 = vst [vmem:[%s502_s5] sm:$0xff] %v255_v41 }

// kernel: gnns_forward.5
= control target key start
LH: loop header
LB: loop body
LE: loop exit
PB: predicated region body
PF: predicated region fallthrough
CT: control target
= control target key end

     0   :  { %s1508_s1 = inlined_call_operand.vmem [shape: bf16[128,128], index: 1, kind: input, shape index: {}]   ;;  %s1509_s0 = inlined_call_operand.vmem [shape: s8[128,128], index: 0, kind: input, shape index: {}]   ;;  %s1510_s2 = inlined_call_operand.vmem [shape: f32[128,128], index: 2, kind: input, shape index: {}]   ;;  %s1511_s4 = inlined_call_operand.vmem [shape: f32[128,128], index: 4, kind: input, shape index: {}]   ;;  %s1512_s3 = inlined_call_operand.vmem [shape: f32[1,128], index: 3, kind: input, shape index: {}]   ;;  %s1513_s5 = inlined_call_operand.vmem [shape: bf16[128,128], index: 5, kind: output, shape index: {}]  }
   0x1   :  { %v1137_v0 = vld [vmem:[%s1508_s1 + $0x38] sm:$0xff]   ;;  %v1138_v1 = vld [vmem:[%s1508_s1 + $0x30] sm:$0xff]   ;;  %v1139_v2 = vld [vmem:[%s1508_s1 + $0x28] sm:$0xff]  }
   0x2   :  { %961 = vmatprep.subr.bf16.mxu0 %v1137_v0  ;;  %v1140_v3 = vld [vmem:[%s1508_s1 + $0x20] sm:$0xff]   ;;  %v1141_v9 = vld [vmem:[%s1508_s1 + $0x18] sm:$0xff]   ;;  %v313_v11 = vld [vmem:[%s1510_s2 + $0x70] sm:$0xff] }
   0x3   :  { %962 = vmatpush3.bf16.msra.mxu0 %v1137_v0  ;;  %v21_v4 = vld [vmem:[%s1509_s0] sm:$0x3]  ;;  %v22_v5 = vld [vmem:[%s1509_s0 + $0x2] sm:$0x3]  ;;  %v314_v10 = vld [vmem:[%s1510_s2 + $0x78] sm:$0xff] }
   0x4   :  { %963 = vmatprep.subr.bf16.mxu0 %v1138_v1  ;;  %v37_v6 = vunpack.c.l.s8.bf16 %v21_v4  ;;  %v38_v7 = vunpack.c.l.s8.bf16 %v22_v5  ;;  %993 = vmatprep.subr.mxu1 %v314_v10  ;;  %v312_v12 = vld [vmem:[%s1510_s2 + $0x68] sm:$0xff]  ;;  %v1142_v13 = vld [vmem:[%s1508_s1 + $0x10] sm:$0xff]   ;;  %v311_v14 = vld [vmem:[%s1510_s2 + $0x60] sm:$0xff] }
   0x5   :  { %994 = vmatpush3.msra.mxu1 %v314_v10  ;;  %v310_v15 = vld [vmem:[%s1510_s2 + $0x58] sm:$0xff]  ;;  %v1143_v16 = vld [vmem:[%s1508_s1 + $0x8] sm:$0xff]   ;;  %v309_v17 = vld [vmem:[%s1510_s2 + $0x50] sm:$0xff] }
   0x6   :  { %v746_v8 = vcombine.low %v37_v6, %v38_v7  ;;  %995 = vmatprep.subr.mxu1 %v313_v11  ;;  %v23_v18 = vld [vmem:[%s1509_s0 + $0x4] sm:$0x3]  ;;  %v24_v19 = vld [vmem:[%s1509_s0 + $0x6] sm:$0x3]  ;;  %v308_v20 = vld [vmem:[%s1510_s2 + $0x48] sm:$0xff] }
   0x7   :  { %964 = vmatpush3.bf16.msra.mxu0 %v1138_v1  ;;  %996 = vmatpush3.msra.mxu1 %v313_v11  ;;  %v1144_v21 = vld [vmem:[%s1508_s1] sm:$0xff]   ;;  %v25_v22 = vld [vmem:[%s1509_s0 + $0x8] sm:$0x3]  ;;  %v26_v23 = vld [vmem:[%s1509_s0 + $0xa] sm:$0x3]  ;;  %v39_v25 = vunpack.c.l.s8.bf16 %v23_v18  ;;  %v40_v26 = vunpack.c.l.s8.bf16 %v24_v19 }
   0x8   :  { %965 = vmatprep.subr.bf16.mxu0 %v1139_v2  ;;  %977 = vmatprep.mubr.bf16.mxu0 %v746_v8  ;;  %v307_v24 = vld [vmem:[%s1510_s2 + $0x40] sm:$0xff]  ;;  %v41_v27 = vunpack.c.l.s8.bf16 %v25_v22  ;;  %v42_v28 = vunpack.c.l.s8.bf16 %v26_v23  ;;  %v306_v29 = vld [vmem:[%s1510_s2 + $0x38] sm:$0xff]  ;;  %v305_v31 = vld [vmem:[%s1510_s2 + $0x30] sm:$0xff] }
   0x9   :  { %997 = vmatprep.subr.mxu1 %v312_v12  ;;  %v1247_v30 = vld [vmem:[%s1511_s4 + $0x78] sm:$0xff]  ;;  %v747_v32 = vcombine.low %v39_v25, %v40_v26  ;;  %v27_v34 = vld [vmem:[%s1509_s0 + $0xc] sm:$0x3]  ;;  %v28_v35 = vld [vmem:[%s1509_s0 + $0xe] sm:$0x3] }
   0xa   :  { %998 = vmatpush3.msra.mxu1 %v312_v12  ;;  %v748_v33 = vcombine.low %v41_v27, %v42_v28  ;;  %v304_v36 = vld [vmem:[%s1510_s2 + $0x28] sm:$0xff]  ;;  %v29_v37 = vld [vmem:[%s1509_s0 + $0x10] sm:$0x3]  ;;  %v30_v38 = vld [vmem:[%s1509_s0 + $0x12] sm:$0x3]  ;;  %v43_v40 = vunpack.c.l.s8.bf16 %v27_v34  ;;  %v44_v41 = vunpack.c.l.s8.bf16 %v28_v35 }
   0xb   :  { %966 = vmatpush3.bf16.msra.mxu0 %v1139_v2  ;;  %999 = vmatprep.subr.mxu1 %v311_v14  ;;  %v1271_v39 = vld [vmem:[%s1511_s4 + $0x70] sm:$0xff]  ;;  %v303_v42 = vld [vmem:[%s1510_s2 + $0x20] sm:$0xff]  ;;  %v45_v43 = vunpack.c.l.s8.bf16 %v29_v37  ;;  %v46_v44 = vunpack.c.l.s8.bf16 %v30_v38  ;;  %v1280_v45 = vld [vmem:[%s1511_s4 + $0x68] sm:$0xff] }
   0xc   :  { %967 = vmatprep.subr.bf16.mxu0 %v1140_v3  ;;  %1000 = vmatpush3.msra.mxu1 %v311_v14  ;;  %v302_v46 = vld [vmem:[%s1510_s2 + $0x18] sm:$0xff]  ;;  %v1290_v47 = vld [vmem:[%s1511_s4 + $0x60] sm:$0xff]  ;;  %v749_v48 = vcombine.low %v43_v40, %v44_v41  ;;  %v31_v50 = vld [vmem:[%s1509_s0 + $0x14] sm:$0x3] }
   0xd   :  { %1001 = vmatprep.subr.mxu1 %v310_v15  ;;  %v750_v49 = vcombine.low %v45_v43, %v46_v44  ;;  %v32_v51 = vld [vmem:[%s1509_s0 + $0x16] sm:$0x3]  ;;  %v1303_v52 = vld [vmem:[%s1511_s4 + $0x58] sm:$0xff]  ;;  %v47_v56 = vunpack.c.l.s8.bf16 %v31_v50  ;;  %v1323_v60 = vld [vmem:[%s1511_s4 + $0x48] sm:$0xff] }
   0xe   :  { %1002 = vmatpush3.msra.mxu1 %v310_v15  ;;  %v33_v53 = vld [vmem:[%s1509_s0 + $0x18] sm:$0x3]  ;;  %v34_v54 = vld [vmem:[%s1509_s0 + $0x1a] sm:$0x3]  ;;  %v1316_v55 = vld [vmem:[%s1511_s4 + $0x50] sm:$0xff]  ;;  %v48_v57 = vunpack.c.l.s8.bf16 %v32_v51 }
   0xf   :  { %968 = vmatpush3.bf16.msra.mxu0 %v1140_v3  ;;  %1003 = vmatprep.subr.mxu1 %v309_v17  ;;  %v49_v58 = vunpack.c.l.s8.bf16 %v33_v53  ;;  %v50_v59 = vunpack.c.l.s8.bf16 %v34_v54  ;;  %v1330_v61 = vld [vmem:[%s1511_s4 + $0x40] sm:$0xff]  ;;  %v35_v0 = vld [vmem:[%s1509_s0 + $0x1c] sm:$0x3]  ;;  %v36_v1 = vld [vmem:[%s1509_s0 + $0x1e] sm:$0x3] }
  0x10   :  { %969 = vmatprep.subr.bf16.mxu0 %v1141_v9  ;;  %1004 = vmatpush3.msra.mxu1 %v309_v17  ;;  %v751_v62 = vcombine.low %v47_v56, %v48_v57  ;;  %v1343_v2 = vld [vmem:[%s1511_s4 + $0x38] sm:$0xff]  ;;  %v1350_v3 = vld [vmem:[%s1511_s4 + $0x30] sm:$0xff]  ;;  %v51_v4 = vunpack.c.l.s8.bf16 %v35_v0  ;;  %v52_v5 = vunpack.c.l.s8.bf16 %v36_v1  ;;  %v1357_v6 = vld [vmem:[%s1511_s4 + $0x28] sm:$0xff] }
  0x11   :  { %1005 = vmatprep.subr.mxu1 %v308_v20  ;;  %v752_v63 = vcombine.low %v49_v58, %v50_v59  ;;  %v1364_v7 = vld [vmem:[%s1511_s4 + $0x20] sm:$0xff]  ;;  %v1376_v10 = vld [vmem:[%s1511_s4 + $0x18] sm:$0xff]  ;;  %v300_v11 = vld [vmem:[%s1510_s2 + $0x8] sm:$0xff] }
  0x12   :  { %1006 = vmatpush3.msra.mxu1 %v308_v20  ;;  %v753_v8 = vcombine.low %v51_v4, %v52_v5  ;;  %v1386_v12 = vld [vmem:[%s1511_s4 + $0x10] sm:$0xff]  ;;  %v1396_v14 = vld [vmem:[%s1511_s4 + $0x8] sm:$0xff]  ;;  %v796_v15 = vld [vmem:[%s1508_s1] sm:$0xff]  }
  0x13   :  { %970 = vmatpush3.bf16.msra.mxu0 %v1141_v9  ;;  %1007 = vmatprep.subr.mxu1 %v307_v24  ;;  %v301_v9 = vld [vmem:[%s1510_s2 + $0x10] sm:$0xff]  ;;  %v797_v17 = vunpack.c.l.bf16 %v796_v15  ;;  %v798_v18 = vunpack.c.h.bf16 %v796_v15  ;;  %v867_v19 = vld [vmem:[%s1508_s1 + $0x8] sm:$0xff]   ;;  %v869_v25 = vld [vmem:[%s1508_s1 + $0x18] sm:$0xff]  }
  0x14   :  { %971 = vmatprep.subr.bf16.mxu0 %v1142_v13  ;;  %1008 = vmatpush3.msra.mxu1 %v307_v24  ;;  %v801_v20 = vunpack.c.l.bf16 %v867_v19  ;;  %v868_v22 = vld [vmem:[%s1508_s1 + $0x10] sm:$0xff]   ;;  %v809_v26 = vunpack.c.l.bf16 %v869_v25  ;;  %v810_v27 = vunpack.c.h.bf16 %v869_v25  ;;  %v870_v43 = vld [vmem:[%s1508_s1 + $0x20] sm:$0xff]  }
  0x15   :  { %1009 = vmatprep.subr.mxu1 %v306_v29  ;;  %v805_v23 = vunpack.c.l.bf16 %v868_v22  ;;  %v806_v24 = vunpack.c.h.bf16 %v868_v22  ;;  %v1466_v59 = vld [vmem:[%s1512_s3] ss:$0 sm:$0xff] }
  0x16   :  { %1010 = vmatpush3.msra.mxu1 %v306_v29 }
  0x17   :  { %972 = vmatpush3.bf16.msra.mxu0 %v1142_v13  ;;  %1011 = vmatprep.subr.mxu1 %v305_v31  ;;  %v299_v13 = vld [vmem:[%s1510_s2] sm:$0xff] }
  0x18   :  { %973 = vmatprep.subr.bf16.mxu0 %v1143_v16  ;;  %1012 = vmatpush3.msra.mxu1 %v305_v31 }
  0x19   :  { %1013 = vmatprep.subr.mxu1 %v304_v36 }
  0x1a   :  { %1014 = vmatpush3.msra.mxu1 %v304_v36 }
  0x1b   :  { %974 = vmatpush3.bf16.msra.mxu0 %v1143_v16  ;;  %1015 = vmatprep.subr.mxu1 %v303_v42  ;;  %v1406_v16 = vld [vmem:[%s1511_s4] sm:$0xff] }
  0x1c   :  { %975 = vmatprep.subr.bf16.mxu0 %v1144_v21  ;;  %1016 = vmatpush3.msra.mxu1 %v303_v42 }
  0x1d   :  { %1017 = vmatprep.subr.mxu1 %v302_v46 }
  0x1e   :  { %1018 = vmatpush3.msra.mxu1 %v302_v46  ;;  %v871_v46 = vld [vmem:[%s1508_s1 + $0x28] sm:$0xff]  }
  0x1f   :  { %976 = vmatpush3.bf16.msra.mxu0 %v1144_v21  ;;  %1019 = vmatprep.subr.mxu1 %v301_v9  ;;  %v802_v21 = vunpack.c.h.bf16 %v867_v19  ;;  %v818_v50 = vunpack.c.h.bf16 %v871_v46 }
  0x20   :  { %1049 = vmatprep.subr.mxu0 %v1247_v30  ;;  %1020 = vmatpush3.msra.mxu1 %v301_v9 }
  0x21   :  { %1021 = vmatprep.subr.mxu1 %v300_v11 }
  0x22   :  { %978 = vmatmul.mubr.bf16.vlgmr.msra.gmra.mxu0 %v747_v32  ;;  %1022 = vmatpush3.msra.mxu1 %v300_v11 }
  0x23   :  { %981 = vmatprep.mubr.bf16.mxu0 %v748_v33  ;;  %1050 = vmatpush3.msra.mxu0 %v1247_v30 }
  0x24   :  { %1051 = vmatprep.subr.mxu0 %v1271_v39  ;;  %1023 = vmatprep.subr.mxu1 %v299_v13 }
  0x25   :  { %1052 = vmatpush3.msra.mxu0 %v1271_v39  ;;  %1024 = vmatpush3.msra.mxu1 %v299_v13 }
  0x26   :  { %1053 = vmatprep.subr.mxu0 %v1280_v45  ;;  %1105 = vmatprep.subr.mxu1 %v1247_v30 }
  0x27   :  { %1054 = vmatpush3.msra.mxu0 %v1280_v45 }
  0x28   :  { %1055 = vmatprep.subr.mxu0 %v1290_v47 }
  0x29   :  { %1056 = vmatpush3.msra.mxu0 %v1290_v47 }
  0x2a   :  { %982 = vmatmul.mubr.bf16.gmra.mxu0 %v749_v48  ;;  %1057 = vmatprep.subr.mxu0 %v1303_v52  ;;  %v817_v48 = vunpack.c.l.bf16 %v871_v46 }
  0x2b   :  { %985 = vmatprep.mubr.bf16.mxu0 %v750_v49  ;;  %1058 = vmatpush3.msra.mxu0 %v1303_v52  ;;  %v872_v49 = vld [vmem:[%s1508_s1 + $0x30] sm:$0xff]  }
  0x2c   :  { %1059 = vmatprep.subr.mxu0 %v1316_v55  ;;  %v821_v51 = vunpack.c.l.bf16 %v872_v49  ;;  %v822_v53 = vunpack.c.h.bf16 %v872_v49 }
  0x2d   :  { %1060 = vmatpush3.msra.mxu0 %v1316_v55 }
  0x2e   :  { %1061 = vmatprep.subr.mxu0 %v1323_v60 }
  0x2f   :  { %1062 = vmatpush3.msra.mxu0 %v1323_v60 }
  0x30   :  { %1063 = vmatprep.subr.mxu0 %v1330_v61 }
  0x31   :  { %1064 = vmatpush3.msra.mxu0 %v1330_v61 }
  0x32   :  { %986 = vmatmul.mubr.bf16.gmra.mxu0 %v751_v62  ;;  %1065 = vmatprep.subr.mxu0 %v1343_v2 }
  0x33   :  { %989 = vmatprep.mubr.bf16.mxu0 %v752_v63  ;;  %1066 = vmatpush3.msra.mxu0 %v1343_v2 }
  0x34   :  { %1067 = vmatprep.subr.mxu0 %v1350_v3 }
  0x35   :  { %1068 = vmatpush3.msra.mxu0 %v1350_v3 }
  0x36   :  { %1069 = vmatprep.subr.mxu0 %v1357_v6 }
  0x37   :  { %1070 = vmatpush3.msra.mxu0 %v1357_v6 }
  0x38   :  { %1071 = vmatprep.subr.mxu0 %v1364_v7 }
  0x39   :  { %1072 = vmatpush3.msra.mxu0 %v1364_v7 }
  0x3a   :  { %990 = vmatmul.mubr.bf16.gmra.mxu0 %v753_v8  ;;  %1073 = vmatprep.subr.mxu0 %v1376_v10 }
  0x3b   :  { %1074 = vmatpush3.msra.mxu0 %v1376_v10  ;;  %1081 = vmatprep.mubr.f32.mxu0 %v797_v17 }
  0x3c   :  { %1075 = vmatprep.subr.mxu0 %v1386_v12 }
  0x3d   :  { %1076 = vmatpush3.msra.mxu0 %v1386_v12 }
  0x3e   :  { %1077 = vmatprep.subr.mxu0 %v1396_v14 }
  0x3f   :  { %1078 = vmatpush3.msra.mxu0 %v1396_v14 }
  0x40   :  { %1079 = vmatprep.subr.mxu0 %v1406_v16 }
  0x41   :  { %1080 = vmatpush3.msra.mxu0 %v1406_v16 }
  0x42   :  { %1082 = vmatmul.mubr.f32.vlgmr.msra.gmra.mxu0 %v798_v18 }
  0x43   :  { %1084 = vmatprep.mubr.f32.mxu0 %v801_v20 }
  0x46   :  { %1085 = vmatmul.mubr.f32.gmra.mxu0 %v802_v21 }
  0x47   :  { %1087 = vmatprep.mubr.f32.mxu0 %v805_v23 }
  0x4a   :  { %1088 = vmatmul.mubr.f32.gmra.mxu0 %v806_v24 }
  0x4b   :  { %1090 = vmatprep.mubr.f32.mxu0 %v809_v26 }
  0x4e   :  { %1091 = vmatmul.mubr.f32.gmra.mxu0 %v810_v27 }
  0xe2   :  { %v979_v28 = vpop.f32.mrf.mxu0 }
  0xe4   :  { %v199_v29 = vpop.f32.mrf.mxu0 }
  0xe5   :  { %1025 = vmatprep.mubr.f32.mxu1 %v199_v29 }
  0xe6   :  { %v980_v31 = vpop.f32.mrf.mxu0 }
  0xe8   :  { %v202_v32 = vpop.f32.mrf.mxu0 }
  0xe9   :  { %1026 = vmatmul.mubr.f32.vlgmr.msra.gmra.mxu1 %v202_v32 }
  0xea   :  { %1121 = vmatpush3.msra.mxu1 %v1247_v30  ;;  %v983_v33 = vpop.f32.mrf.mxu0  ;;  %1028 = vmatprep.mubr.f32.mxu1 %v979_v28 }
  0xeb   :  { %1106 = vmatprep.subr.mxu1 %v1271_v39 }
  0xec   :  { %1122 = vmatpush3.msra.mxu1 %v1271_v39  ;;  %v215_v34 = vpop.f32.mrf.mxu0 }
  0xed   :  { %1107 = vmatprep.subr.mxu1 %v1280_v45  ;;  %1029 = vmatmul.mubr.f32.gmra.mxu1 %v980_v31 }
  0xee   :  { %1123 = vmatpush3.msra.mxu1 %v1280_v45  ;;  %v984_v35 = vpop.f32.mrf.mxu0  ;;  %1031 = vmatprep.mubr.f32.mxu1 %v215_v34  ;;  %v813_v45 = vunpack.c.l.bf16 %v870_v43 }
  0xef   :  { %1108 = vmatprep.subr.mxu1 %v1290_v47 }
  0xf0   :  { %1124 = vmatpush3.msra.mxu1 %v1290_v47  ;;  %v218_v36 = vpop.f32.mrf.mxu0  ;;  %v814_v47 = vunpack.c.h.bf16 %v870_v43 }
  0xf1   :  { %1109 = vmatprep.subr.mxu1 %v1303_v52  ;;  %1032 = vmatmul.mubr.f32.gmra.mxu1 %v218_v36 }
  0xf2   :  { %1125 = vmatpush3.msra.mxu1 %v1303_v52  ;;  %v987_v30 = vpop.f32.mrf.mxu0  ;;  %1034 = vmatprep.mubr.f32.mxu1 %v983_v33  ;;  %v873_v52 = vld [vmem:[%s1508_s1 + $0x38] sm:$0xff]  }
  0xf3   :  { %1110 = vmatprep.subr.mxu1 %v1316_v55  ;;  %v825_v54 = vunpack.c.l.bf16 %v873_v52 }
  0xf4   :  { %1126 = vmatpush3.msra.mxu1 %v1316_v55  ;;  %v231_v37 = vpop.f32.mrf.mxu0  ;;  %v826_v55 = vunpack.c.h.bf16 %v873_v52 }
  0xf5   :  { %1111 = vmatprep.subr.mxu1 %v1323_v60  ;;  %1035 = vmatmul.mubr.f32.gmra.mxu1 %v984_v35 }
  0xf6   :  { %1127 = vmatpush3.msra.mxu1 %v1323_v60  ;;  %v988_v38 = vpop.f32.mrf.mxu0  ;;  %1037 = vmatprep.mubr.f32.mxu1 %v231_v37 }
  0xf7   :  { %1112 = vmatprep.subr.mxu1 %v1330_v61 }
  0xf8   :  { %1128 = vmatpush3.msra.mxu1 %v1330_v61  ;;  %v234_v39 = vpop.f32.mrf.mxu0 }
  0xf9   :  { %1113 = vmatprep.subr.mxu1 %v1343_v2  ;;  %1038 = vmatmul.mubr.f32.gmra.mxu1 %v234_v39 }
  0xfa   :  { %1129 = vmatpush3.msra.mxu1 %v1343_v2  ;;  %v991_v40 = vpop.f32.mrf.mxu0  ;;  %1040 = vmatprep.mubr.f32.mxu1 %v987_v30 }
  0xfb   :  { %1114 = vmatprep.subr.mxu1 %v1350_v3 }
  0xfc   :  { %1130 = vmatpush3.msra.mxu1 %v1350_v3  ;;  %v247_v41 = vpop.f32.mrf.mxu0 }
  0xfd   :  { %1115 = vmatprep.subr.mxu1 %v1357_v6  ;;  %1041 = vmatmul.mubr.f32.gmra.mxu1 %v988_v38 }
  0xfe   :  { %1131 = vmatpush3.msra.mxu1 %v1357_v6  ;;  %v992_v42 = vpop.f32.mrf.mxu0  ;;  %1043 = vmatprep.mubr.f32.mxu1 %v247_v41 }
  0xff   :  { %1116 = vmatprep.subr.mxu1 %v1364_v7 }
 0x100   :  { %1132 = vmatpush3.msra.mxu1 %v1364_v7  ;;  %v250_v44 = vpop.f32.mrf.mxu0 }
 0x101   :  { %1117 = vmatprep.subr.mxu1 %v1376_v10  ;;  %1044 = vmatmul.mubr.f32.gmra.mxu1 %v250_v44 }
 0x102   :  { %1133 = vmatpush3.msra.mxu1 %v1376_v10  ;;  %1046 = vmatprep.mubr.f32.mxu1 %v991_v40  ;;  %v1083_v56 = vpop.f32.mrf.mxu0 }
 0x103   :  { %1118 = vmatprep.subr.mxu1 %v1386_v12 }
 0x104   :  { %1134 = vmatpush3.msra.mxu1 %v1386_v12  ;;  %v549_v57 = vpop.f32.mrf.mxu0 }
 0x105   :  { %1119 = vmatprep.subr.mxu1 %v1396_v14  ;;  %1047 = vmatmul.mubr.f32.gmra.mxu1 %v992_v42 }
 0x106   :  { %1135 = vmatpush3.msra.mxu1 %v1396_v14  ;;  %1093 = vmatprep.mubr.f32.mxu1 %v813_v45  ;;  %v1086_v58 = vpop.f32.mrf.mxu0 }
 0x107   :  { %1120 = vmatprep.subr.mxu1 %v1406_v16 }
 0x108   :  { %1136 = vmatpush3.msra.mxu1 %v1406_v16  ;;  %v559_v60 = vpop.f32.mrf.mxu0 }
 0x109   :  { %1094 = vmatmul.mubr.f32.vlgmr.msra.gmra.mxu1 %v814_v47 }
 0x10a   :  { %1096 = vmatprep.mubr.f32.mxu1 %v817_v48  ;;  %v1089_v0 = vpop.f32.mrf.mxu0 }
 0x10c   :  { %v569_v7 = vpop.f32.mrf.mxu0 }
 0x10d   :  { %1097 = vmatmul.mubr.f32.gmra.mxu1 %v818_v50 }
 0x10e   :  { %1099 = vmatprep.mubr.f32.mxu1 %v821_v51  ;;  %v1092_v17 = vpop.f32.mrf.mxu0 }
 0x110   :  { %v579_v27 = vpop.f32.mrf.mxu0 }
 0x111   :  { %1100 = vmatmul.mubr.f32.gmra.mxu1 %v822_v53 }
 0x112   :  { %1102 = vmatprep.mubr.f32.mxu1 %v825_v54 }
 0x115   :  { %1103 = vmatmul.mubr.f32.gmra.mxu1 %v826_v55 }
 0x1a9   :  { %v1027_v61 = vpop.f32.mrf.mxu1 }
 0x1aa   :  { %v394_v62 = vadd.f32 %v1027_v61, %v1466_v59 }
 0x1ab   :  { %v388_v63 = vpop.f32.mrf.mxu1 }
 0x1ac   :  { %v389_v1 = vadd.f32 %v1466_v59, %v388_v63  ;;  %v629_v2 = vadd.f32 %v1083_v56, %v394_v62 }
 0x1ad   :  { %v1030_v3 = vpop.f32.mrf.mxu1 }
 0x1ae   :  { %v404_v4 = vadd.f32 %v1030_v3, %v1466_v59  ;;  %v628_v5 = vadd.f32 %v549_v57, %v389_v1  ;;  %v645_v8 = vmax.f32 %v629_v2, 0.0 }
 0x1af   :  { %v398_v6 = vpop.f32.mrf.mxu1 }
 0x1b0   :  { %v644_v9 = vmax.f32 %v628_v5, 0.0  ;;  %v399_v10 = vadd.f32 %v1466_v59, %v398_v6  ;;  %v631_v11 = vadd.f32 %v1086_v58, %v404_v4 }
 0x1b1   :  { %v1033_v12 = vpop.f32.mrf.mxu1 }
 0x1b2   :  { %v830_v13 = vpack.c.bf16 %v645_v8, %v644_v9  ;;  %v414_v14 = vadd.f32 %v1033_v12, %v1466_v59  ;;  %v630_v15 = vadd.f32 %v559_v60, %v399_v10  ;;  %v647_v18 = vmax.f32 %v631_v11, 0.0 }
 0x1b3   :  { %v408_v16 = vpop.f32.mrf.mxu1 }
 0x1b4   :  { %831 = vst [vmem:[%s1513_s5] sm:$0xff] %v830_v13   ;;  %v646_v19 = vmax.f32 %v630_v15, 0.0  ;;  %v409_v20 = vadd.f32 %v1466_v59, %v408_v16  ;;  %v633_v21 = vadd.f32 %v1089_v0, %v414_v14 }
 0x1b5   :  { %v1036_v22 = vpop.f32.mrf.mxu1 }
 0x1b6   :  { %v835_v23 = vpack.c.bf16 %v647_v18, %v646_v19  ;;  %v424_v24 = vadd.f32 %v1036_v22, %v1466_v59  ;;  %v632_v25 = vadd.f32 %v569_v7, %v409_v20  ;;  %v649_v28 = vmax.f32 %v633_v21, 0.0 }
 0x1b7   :  { %v418_v26 = vpop.f32.mrf.mxu1 }
 0x1b8   :  { %874 = vst [vmem:[%s1513_s5 + $0x8] sm:$0xff] %v835_v23   ;;  %v648_v29 = vmax.f32 %v632_v25, 0.0  ;;  %v419_v31 = vadd.f32 %v1466_v59, %v418_v26  ;;  %v635_v32 = vadd.f32 %v1092_v17, %v424_v24 }
 0x1b9   :  { %v1039_v33 = vpop.f32.mrf.mxu1 }
 0x1ba   :  { %v840_v34 = vpack.c.bf16 %v649_v28, %v648_v29  ;;  %v634_v35 = vadd.f32 %v579_v27, %v419_v31  ;;  %v651_v30 = vmax.f32 %v635_v32, 0.0  ;;  %v434_v45 = vadd.f32 %v1039_v33, %v1466_v59 }
 0x1bb   :  { %v428_v36 = vpop.f32.mrf.mxu1 }
 0x1bc   :  { %875 = vst [vmem:[%s1513_s5 + $0x10] sm:$0xff] %v840_v34   ;;  %v650_v37 = vmax.f32 %v634_v35, 0.0  ;;  %v429_v47 = vadd.f32 %v1466_v59, %v428_v36 }
 0x1bd   :  { %v1042_v38 = vpop.f32.mrf.mxu1 }
 0x1be   :  { %v845_v39 = vpack.c.bf16 %v651_v30, %v650_v37  ;;  %v444_v50 = vadd.f32 %v1042_v38, %v1466_v59 }
 0x1bf   :  { %v438_v40 = vpop.f32.mrf.mxu1 }
 0x1c0   :  { %876 = vst [vmem:[%s1513_s5 + $0x18] sm:$0xff] %v845_v39   ;;  %v439_v53 = vadd.f32 %v1466_v59, %v438_v40 }
 0x1c1   :  { %v1045_v41 = vpop.f32.mrf.mxu1 }
 0x1c2   :  { %v454_v58 = vadd.f32 %v1045_v41, %v1466_v59 }
 0x1c3   :  { %v448_v42 = vpop.f32.mrf.mxu1 }
 0x1c4   :  { %v449_v63 = vadd.f32 %v1466_v59, %v448_v42 }
 0x1c5   :  { %v1048_v43 = vpop.f32.mrf.mxu1 }
 0x1c6   :  { %v464_v4 = vadd.f32 %v1048_v43, %v1466_v59 }
 0x1c7   :  { %v458_v44 = vpop.f32.mrf.mxu1 }
 0x1c8   :  { %v459_v8 = vadd.f32 %v1466_v59, %v458_v44 }
 0x1c9   :  { %v1095_v46 = vpop.f32.mrf.mxu1 }
 0x1ca   :  { %v637_v48 = vadd.f32 %v1095_v46, %v434_v45 }
 0x1cb   :  { %v589_v49 = vpop.f32.mrf.mxu1 }
 0x1cc   :  { %v636_v51 = vadd.f32 %v589_v49, %v429_v47  ;;  %v653_v54 = vmax.f32 %v637_v48, 0.0 }
 0x1cd   :  { %v1098_v52 = vpop.f32.mrf.mxu1 }
 0x1ce   :  { %v652_v55 = vmax.f32 %v636_v51, 0.0  ;;  %v639_v56 = vadd.f32 %v1098_v52, %v444_v50 }
 0x1cf   :  { %v599_v57 = vpop.f32.mrf.mxu1 }
 0x1d0   :  { %v850_v60 = vpack.c.bf16 %v653_v54, %v652_v55  ;;  %v638_v61 = vadd.f32 %v599_v57, %v439_v53  ;;  %v655_v0 = vmax.f32 %v639_v56, 0.0 }
 0x1d1   :  { %v1101_v62 = vpop.f32.mrf.mxu1 }
 0x1d2   :  { %877 = vst [vmem:[%s1513_s5 + $0x20] sm:$0xff] %v850_v60   ;;  %v654_v1 = vmax.f32 %v638_v61, 0.0  ;;  %v641_v2 = vadd.f32 %v1101_v62, %v454_v58 }
 0x1d3   :  { %v609_v3 = vpop.f32.mrf.mxu1 }
 0x1d4   :  { %v855_v5 = vpack.c.bf16 %v655_v0, %v654_v1  ;;  %v640_v6 = vadd.f32 %v609_v3, %v449_v63  ;;  %v657_v9 = vmax.f32 %v641_v2, 0.0 }
 0x1d5   :  { %v1104_v7 = vpop.f32.mrf.mxu1 }
 0x1d6   :  { %878 = vst [vmem:[%s1513_s5 + $0x28] sm:$0xff] %v855_v5   ;;  %v656_v10 = vmax.f32 %v640_v6, 0.0  ;;  %v643_v11 = vadd.f32 %v1104_v7, %v464_v4 }
 0x1d7   :  { %v619_v12 = vpop.f32.mrf.mxu1 }
 0x1d8   :  { %v860_v13 = vpack.c.bf16 %v657_v9, %v656_v10  ;;  %v642_v14 = vadd.f32 %v619_v12, %v459_v8  ;;  %v659_v15 = vmax.f32 %v643_v11, 0.0 }
 0x1da   :  { %879 = vst [vmem:[%s1513_s5 + $0x30] sm:$0xff] %v860_v13   ;;  %v658_v16 = vmax.f32 %v642_v14, 0.0 }
 0x1dc   :  { %v865_v17 = vpack.c.bf16 %v659_v15, %v658_v16 }
 0x1de   :  { %880 = vst [vmem:[%s1513_s5 + $0x38] sm:$0xff] %v865_v17  }

</bundles_post_ra>
